<compile_context>
chip_gen: v6e
topology: v6e:2x2x1
jax: 0.10.0
libtpu: 0.0.40
codegen_flags: <defaults>
</compile_context>

<pallas_src>
import functools

import numpy as np

import jax
import jax.numpy as jnp
from jax.experimental import pallas as pl
from jax.experimental.pallas import tpu as pltpu


def _cparams():
    # Tiles here are tiny; the explicit limit documents the budget (v7x-safe).
    return pltpu.CompilerParams(
        dimension_semantics=("parallel",),
        vmem_limit_bytes=32 * 1024 * 1024,
    )


# ---------------------------------------------------------------------------
# Weight packing: 3x3 convs become 3 block-Toeplitz matmuls (one per dy) on a
# lane-major (rows, W*C) layout; the 1x1 RPN head becomes one block-diagonal
# matmul.  Packing is done once at init (resolution-specific, like a plan).
# ---------------------------------------------------------------------------
def _pack_toeplitz_padded(k, W):
    # k: (3, 3, CIN, COUT).  Input rows are width-PADDED: (W+2)*CIN lanes.
    _, _, CIN, COUT = k.shape
    out = np.zeros((3, (W + 2) * CIN, W * COUT), np.float32)
    for dy in range(3):
        for dx in range(3):
            for w in range(W):
                u = w + dx
                out[dy, u * CIN:(u + 1) * CIN, w * COUT:(w + 1) * COUT] = k[dy, dx]
    return out


def _pack_toeplitz_valid(k, W):
    # k: (3, 3, CIN, COUT).  Input rows are UNPADDED in width (W*CIN lanes);
    # the zero width-padding of the conv is folded into the weights (edge
    # output columns simply have no contribution from out-of-range taps).
    _, _, CIN, COUT = k.shape
    out = np.zeros((3, W * CIN, W * COUT), np.float32)
    for dy in range(3):
        for dx in range(3):
            for w in range(W):
                u = w + dx - 1
                if 0 <= u < W:
                    out[dy, u * CIN:(u + 1) * CIN, w * COUT:(w + 1) * COUT] = k[dy, dx]
    return out


def _pack_blockdiag(wh, W):
    # wh: (CIN, HEADC) 1x1 head applied per pixel on a (H, W*CIN) layout.
    CIN, HEADC = wh.shape
    out = np.zeros((W * CIN, W * HEADC), np.float32)
    for w in range(W):
        out[w * CIN:(w + 1) * CIN, w * HEADC:(w + 1) * HEADC] = wh
    return out


# ---------------------------------------------------------------------------
# Kernel 1 (fused): backbone 3x3 conv (+folded normalize) + ReLU, in-VMEM
# height-padding of the feature, RPN 3x3 conv + ReLU, fused 1x1 RPN head.
#   x_ref    : (1, H+2, (W+2)*CINP) bf16   mean-padded image, lane-major
#   wbb_ref  : (3, (W+2)*CINP, W*CMID) bf16  block-Toeplitz backbone weights
#   bbb_ref  : (1, W*CMID) f32
#   wrc_ref  : (3, W*CMID, W*CMID) bf16      block-Toeplitz RPN conv weights
#   brc_ref  : (1, W*CMID) f32
#   whd_ref  : (W*CMID, W*HEADC) bf16        block-diagonal RPN head weights
#   bhd_ref  : (1, W*HEADC) f32
#   feat_ref : (1, H, W*CMID)  bf16 out      lane-dense backbone features
#   rpn_ref  : (1, H, W*HEADC) f32  out      per-pixel [obj(3)|reg(12)|pad]
#   fs_ref   : (H+2, W*CMID)   bf16 scratch  height-padded features (VMEM)
# ---------------------------------------------------------------------------
def _backbone_rpn_kernel(x_ref, wbb_ref, bbb_ref, wrc_ref, brc_ref,
                         whd_ref, bhd_ref, feat_ref, rpn_ref, fs_ref, *, H):
    WC = wbb_ref.shape[-1]

    # ---- backbone conv: 3 block-Toeplitz matmuls (K = 144, lane dense) ----
    acc = jnp.zeros((H, WC), jnp.float32)
    for dy in range(3):
        acc += jnp.dot(x_ref[0, dy:dy + H, :], wbb_ref[dy],
                       preferred_element_type=jnp.float32)
    feat = jnp.maximum(acc + bbb_ref[...], 0.0).astype(jnp.bfloat16)
    feat_ref[0] = feat                                  # (16,128) unmasked store

    # ---- height-pad features in VMEM (width pad folded into wrc) ----
    fs_ref[...] = jnp.zeros_like(fs_ref)
    fs_ref[1:H + 1, :] = feat

    # ---- RPN conv: 3 block-Toeplitz matmuls (K = 128) ----
    acc2 = jnp.zeros((H, WC), jnp.float32)
    for dy in range(3):
        acc2 += jnp.dot(fs_ref[dy:dy + H, :], wrc_ref[dy],
                        preferred_element_type=jnp.float32)
    t = jnp.maximum(acc2 + brc_ref[...], 0.0).astype(jnp.bfloat16)

    # ---- fused [objectness | box deltas | pad] 1x1 head (block diagonal) ----
    rpn_ref[0] = (jnp.dot(t, whd_ref[...], preferred_element_type=jnp.float32)
                  + bhd_ref[...])


def backbone_rpn_fused(x_pad, wbb, bbb, wrc, brc, whd, bhd, *, H, W, cmid, headc):
    N, HP, WPC = x_pad.shape
    WC = W * cmid
    WH = W * headc
    kern = functools.partial(_backbone_rpn_kernel, H=H)
    return pl.pallas_call(
        kern,
        out_shape=(jax.ShapeDtypeStruct((N, H, WC), jnp.bfloat16),
                   jax.ShapeDtypeStruct((N, H, WH), jnp.float32)),
        grid=(N,),
        in_specs=[
            pl.BlockSpec((1, HP, WPC), lambda n: (n, 0, 0)),
            pl.BlockSpec((3, WPC, WC), lambda n: (0, 0, 0)),
            pl.BlockSpec((1, WC), lambda n: (0, 0)),
            pl.BlockSpec((3, WC, WC), lambda n: (0, 0, 0)),
            pl.BlockSpec((1, WC), lambda n: (0, 0)),
            pl.BlockSpec((WC, WH), lambda n: (0, 0)),
            pl.BlockSpec((1, WH), lambda n: (0, 0)),
        ],
        out_specs=(pl.BlockSpec((1, H, WC), lambda n: (n, 0, 0)),
                   pl.BlockSpec((1, H, WH), lambda n: (n, 0, 0))),
        scratch_shapes=[pltpu.VMEM((H + 2, WC), jnp.bfloat16)],
        compiler_params=_cparams(),
    )(x_pad, wbb, bbb, wrc, brc, whd, bhd)


# ---------------------------------------------------------------------------
# Kernel 2: fused box head: fc1 + ReLU + fc2 + ReLU + fused [cls|bbox|0-pad]
# predictor.  Single grid step, every matmul is (R,128)x(128,128): bf16 in,
# f32 accumulation, lane-dense loads/stores; intermediates never leave VMEM.
# ---------------------------------------------------------------------------
def _box_head_kernel(x_ref, w1_ref, b1_ref, w2_ref, b2_ref, wp_ref, bp_ref,
                     o_ref):
    h = jnp.dot(x_ref[...], w1_ref[...],
                preferred_element_type=jnp.float32) + b1_ref[...]
    h = jnp.maximum(h, 0.0).astype(jnp.bfloat16)
    h = jnp.dot(h, w2_ref[...], preferred_element_type=jnp.float32) + b2_ref[...]
    h = jnp.maximum(h, 0.0).astype(jnp.bfloat16)
    o_ref[...] = (jnp.dot(h, wp_ref[...], preferred_element_type=jnp.float32)
                  + bp_ref[...])


def box_head(flat, w1, b1, w2, b2, wp, bp):
    R, F = flat.shape
    HID = w1.shape[-1]
    PN = wp.shape[-1]
    return pl.pallas_call(
        _box_head_kernel,
        out_shape=jax.ShapeDtypeStruct((R, PN), jnp.float32),
        grid=(1,),
        in_specs=[
            pl.BlockSpec((R, F), lambda i: (0, 0)),
            pl.BlockSpec((F, HID), lambda i: (0, 0)),
            pl.BlockSpec((1, HID), lambda i: (0, 0)),
            pl.BlockSpec((HID, HID), lambda i: (0, 0)),
            pl.BlockSpec((1, HID), lambda i: (0, 0)),
            pl.BlockSpec((HID, PN), lambda i: (0, 0)),
            pl.BlockSpec((1, PN), lambda i: (0, 0)),
        ],
        out_specs=pl.BlockSpec((R, PN), lambda i: (0, 0)),
        compiler_params=_cparams(),
    )(flat, w1, b1.reshape(1, HID), w2, b2.reshape(1, HID),
      wp, bp.reshape(1, PN))


# ---------------------------------------------------------------------------
# RPN / ROI glue (anchor generation, box decode, proposal selection, pooling)
# ---------------------------------------------------------------------------
def make_anchors(H, W, scales):
    ys = jnp.arange(H, dtype=jnp.float32) + 0.5
    xs = jnp.arange(W, dtype=jnp.float32) + 0.5
    cy, cx = jnp.meshgrid(ys, xs, indexing="ij")
    cy = cy[..., None]
    cx = cx[..., None]
    s = jnp.asarray(scales, dtype=jnp.float32)
    x1 = cx - s / 2.0
    y1 = cy - s / 2.0
    x2 = cx + s / 2.0
    y2 = cy + s / 2.0
    anchors = jnp.stack([x1, y1, x2, y2], axis=-1)       # (H, W, A, 4)
    return anchors.reshape(H * W * len(scales), 4)


def decode_boxes(anchors, deltas, img_h, img_w):
    wa = anchors[:, 2] - anchors[:, 0]
    ha = anchors[:, 3] - anchors[:, 1]
    cxa = anchors[:, 0] + 0.5 * wa
    cya = anchors[:, 1] + 0.5 * ha
    dx, dy = deltas[:, 0], deltas[:, 1]
    dw = jnp.clip(deltas[:, 2], -4.0, 4.0)
    dh = jnp.clip(deltas[:, 3], -4.0, 4.0)
    cx = dx * wa + cxa
    cy = dy * ha + cya
    w = jnp.exp(dw) * wa
    h = jnp.exp(dh) * ha
    x1 = jnp.clip(cx - 0.5 * w, 0.0, img_w)
    y1 = jnp.clip(cy - 0.5 * h, 0.0, img_h)
    x2 = jnp.clip(cx + 0.5 * w, 0.0, img_w)
    y2 = jnp.clip(cy + 0.5 * h, 0.0, img_h)
    return jnp.stack([x1, y1, x2, y2], axis=-1)


def roi_pool_nearest(feat, boxes, pool=4):
    # feat: (H, W, C) single image; boxes: (P, 4) in image coordinates.
    # TODO(synk): move this data-dependent gather into a Pallas kernel with
    # PrefetchScalarGridSpec (quantized iy/ix in SMEM, VMEM-resident features)
    # and use true bilinear ROIAlign.
    H, W, _ = feat.shape
    grid = (jnp.arange(pool, dtype=jnp.float32) + 0.5) / pool

    def one(box):
        x1, y1, x2, y2 = box[0], box[1], box[2], box[3]
        gy = y1 + (y2 - y1) * grid
        gx = x1 + (x2 - x1) * grid
        iy = jnp.clip(jnp.floor(gy).astype(jnp.int32), 0, H - 1)
        ix = jnp.clip(jnp.floor(gx).astype(jnp.int32), 0, W - 1)
        return feat[iy[:, None], ix[None, :], :]          # (pool, pool, C)

    return jax.vmap(one)(boxes)                           # (P, pool, pool, C)


# ---------------------------------------------------------------------------
# Parameters (deterministic, synthetic).  Normalization is folded into the
# backbone conv; convs are packed block-Toeplitz, the RPN head block-diagonal.
# ---------------------------------------------------------------------------
def init_params(key, H=16, W=16, cin=3, cin_pad=8, cmid=8, num_anchors=3,
                num_classes=5, pool=4, hidden=128, headc=16):
    ks = jax.random.split(key, 8)

    def rnd(k, shape, scale=0.1):
        return np.asarray(jax.random.normal(k, shape, jnp.float32)) * scale

    mean = np.array([0.485, 0.456, 0.406], np.float32)
    std = np.array([0.229, 0.224, 0.225], np.float32)

    p = {}
    mean_pad = np.zeros((cin_pad,), np.float32)
    mean_pad[:cin] = mean
    p["img_mean_pad"] = jnp.asarray(mean_pad)   # spatial pad value -> folds to 0

    # backbone 3x3 conv; fold transform.normalize:
    #   sum w*(x-mean)/std + b = sum (w/std)*x + (b - sum w*mean/std)
    kbb = np.zeros((3, 3, cin_pad, cmid), np.float32)
    kbb[:, :, :cin, :] = rnd(ks[0], (3, 3, cin, cmid))
    bbb = np.zeros((cmid,), np.float32)
    kbb_fold = kbb.copy()
    kbb_fold[:, :, :cin, :] /= std[None, None, :, None]
    bbb_fold = bbb - np.einsum("yxco,c->o", kbb[:, :, :cin, :], mean / std)
    p["backbone_w"] = jnp.asarray(_pack_toeplitz_padded(kbb_fold, W), jnp.bfloat16)
    p["backbone_b"] = jnp.asarray(np.tile(bbb_fold, W).reshape(1, W * cmid),
                                  jnp.float32)

    # RPN 3x3 conv (width zero-padding folded into the Toeplitz weights).
    krc = rnd(ks[1], (3, 3, cmid, cmid))
    brc = np.zeros((cmid,), np.float32)
    p["rpn_conv_w"] = jnp.asarray(_pack_toeplitz_valid(krc, W), jnp.bfloat16)
    p["rpn_conv_b"] = jnp.asarray(np.tile(brc, W).reshape(1, W * cmid),
                                  jnp.float32)

    # RPN 1x1 head per pixel: [obj(A) | reg(4A) | zero-pad] -> headc=16 wide,
    # packed block-diagonal over the W pixel blocks of a lane-major row.
    wh = np.zeros((cmid, headc), np.float32)
    wh[:, :num_anchors] = rnd(ks[2], (cmid, num_anchors))
    wh[:, num_anchors:5 * num_anchors] = rnd(ks[3], (cmid, 4 * num_anchors))
    bh = np.zeros((headc,), np.float32)
    p["rpn_head_w"] = jnp.asarray(_pack_blockdiag(wh, W), jnp.bfloat16)
    p["rpn_head_b"] = jnp.asarray(np.tile(bh, W).reshape(1, W * headc),
                                  jnp.float32)

    # ROI box head: two FCs + fused [cls | bbox | zero-pad] predictor,
    # everything 128-wide (lane dense).
    feat_dim = pool * pool * cmid                        # 4*4*8 = 128
    p["fc1_w"] = jnp.asarray(rnd(ks[4], (feat_dim, hidden)), jnp.bfloat16)
    p["fc1_b"] = jnp.zeros((hidden,), jnp.float32)
    p["fc2_w"] = jnp.asarray(rnd(ks[5], (hidden, hidden)), jnp.bfloat16)
    p["fc2_b"] = jnp.zeros((hidden,), jnp.float32)
    pred_pad = 128
    pw = np.zeros((hidden, pred_pad), np.float32)
    pw[:, :num_classes] = rnd(ks[6], (hidden, num_classes))
    pw[:, num_classes:5 * num_classes] = rnd(ks[7], (hidden, 4 * num_classes))
    p["pred_w"] = jnp.asarray(pw, jnp.bfloat16)
    p["pred_b"] = jnp.zeros((pred_pad,), jnp.float32)
    return p


# ---------------------------------------------------------------------------
# FasterRCNNBase.forward (inference path: returns detections)
# ---------------------------------------------------------------------------
def faster_rcnn_forward(params, images_nchw, num_anchors=3, num_classes=5,
                        top_n=8, pool=4, cin_pad=8, cmid=8, headc=16):
    N, C, H, W = images_nchw.shape

    # original_image_sizes = [img.shape[-2:] for img in images]
    original_image_sizes = [(H, W)] * N

    # ---- self.transform(images, targets) ----
    # Normalization is folded into the backbone conv; here we only pad (in
    # bf16): spatially with the per-channel mean (padded taps fold to exactly
    # 0) and channels 3 -> 8 with zeros, laid out lane-major (H+2, (W+2)*8).
    x = jnp.transpose(images_nchw, (0, 2, 3, 1)).astype(jnp.float32)  # NHWC
    base = jnp.broadcast_to(params["img_mean_pad"], (N, H + 2, W + 2, cin_pad))
    x_pad = base.at[:, 1:-1, 1:-1, :C].set(x)
    x_pad = x_pad.reshape(N, H + 2, (W + 2) * cin_pad).astype(jnp.bfloat16)
    image_sizes = [(H, W)] * N            # synthetic transform keeps sizes

    # ---- self.backbone(...) + self.rpn heads (ONE fused pallas_call) ----
    feat2d, rpn_out = backbone_rpn_fused(
        x_pad, params["backbone_w"], params["backbone_b"],
        params["rpn_conv_w"], params["rpn_conv_b"],
        params["rpn_head_w"], params["rpn_head_b"],
        H=H, W=W, cmid=cmid, headc=headc)
    feats = feat2d.reshape(N, H, W, cmid)                # metadata reshape
    features = {"0": feats}                              # OrderedDict([('0', ...)])

    # ---- RPN proposal selection (JAX glue) ----
    rpn_hw = rpn_out.reshape(N, H, W, headc)
    obj = rpn_hw[..., :num_anchors].reshape(N, H * W * num_anchors)
    reg = rpn_hw[..., num_anchors:5 * num_anchors].reshape(
        N, H * W * num_anchors, 4)
    anchors = make_anchors(H, W, [4.0, 8.0, 16.0])       # (H*W*A, 4)

    def rpn_one(scores, deltas):
        boxes = decode_boxes(anchors, deltas, float(H), float(W))
        _, idx = jax.lax.top_k(scores, top_n)
        return boxes[idx]

    proposals = jax.vmap(rpn_one)(obj, reg)              # (N, top_n, 4)
    proposal_losses = {}

    # ---- self.roi_heads(features, proposals, image_sizes, targets) ----
    pooled = jax.vmap(lambda f, b: roi_pool_nearest(f, b, pool))(
        features["0"], proposals)                        # (N, top_n, p, p, Cm) bf16
    flat = pooled.reshape(N * top_n, pool * pool * cmid)  # (N*top_n, 128) bf16
    pred = box_head(flat, params["fc1_w"], params["fc1_b"],
                    params["fc2_w"], params["fc2_b"],
                    params["pred_w"], params["pred_b"])
    cls_logits = pred[:, :num_classes]
    bbox_deltas = pred[:, num_classes:5 * num_classes]

    probs = jax.nn.softmax(cls_logits, axis=-1)          # (N*top_n, classes)
    fg = probs[:, 1:]                                    # drop background
    labels = jnp.argmax(fg, axis=-1) + 1
    scores = jnp.max(fg, axis=-1)
    deltas_all = bbox_deltas.reshape(N * top_n, num_classes, 4)
    sel = jnp.take_along_axis(deltas_all, labels[:, None, None], axis=1)[:, 0]
    det_boxes = decode_boxes(proposals.reshape(N * top_n, 4), sel,
                             float(H), float(W))
    detector_losses = {}

    # ---- self.transform.postprocess(detections, image_sizes, original) ----
    det_boxes = det_boxes.reshape(N, top_n, 4)
    scores = scores.reshape(N, top_n)
    labels = labels.reshape(N, top_n)
    detections = []
    for i in range(N):
        oh, ow = original_image_sizes[i]
        rh, rw = image_sizes[i]
        scale = jnp.array([ow / rw, oh / rh, ow / rw, oh / rh], jnp.float32)
        detections.append({
            "boxes": det_boxes[i] * scale,
            "labels": labels[i],
            "scores": scores[i],
        })

    losses = {}
    losses.update(detector_losses)
    losses.update(proposal_losses)

    # eager_outputs: not training -> return detections
    return detections


# ---------------------------------------------------------------------------
if __name__ == "__main__":
    key = jax.random.PRNGKey(0)
    pkey, ikey = jax.random.split(key)

    params = init_params(pkey, H=16, W=16)
    images = jax.random.uniform(ikey, (2, 3, 16, 16), jnp.float32)  # NCHW

    detections = faster_rcnn_forward(params, images)
    detections = jax.block_until_ready(detections)

    assert len(detections) == 2
    assert detections[0]["boxes"].shape == (8, 4)
    assert detections[0]["scores"].shape == (8,)
    assert detections[0]["labels"].shape == (8,)
    print("KERNEL_OK")
</pallas_src>

<mosaic_0001>
module attributes {stable_mosaic.version = 11 : i64} {
  func.func @_backbone_rpn_kernel(%arg0: i32, %arg1: memref<1x18x144xbf16, #tpu.memory_space<vmem>>, %arg2: memref<3x144x128xbf16, #tpu.memory_space<vmem>>, %arg3: memref<1x128xf32, #tpu.memory_space<vmem>>, %arg4: memref<3x128x128xbf16, #tpu.memory_space<vmem>>, %arg5: memref<1x128xf32, #tpu.memory_space<vmem>>, %arg6: memref<128x256xbf16, #tpu.memory_space<vmem>>, %arg7: memref<1x256xf32, #tpu.memory_space<vmem>>, %arg8: memref<1x16x128xbf16, #tpu.memory_space<vmem>>, %arg9: memref<1x16x256xf32, #tpu.memory_space<vmem>>, %arg10: memref<18x128xbf16, #tpu.memory_space<vmem>>) attributes {dimension_semantics = [#tpu.dimension_semantics<parallel>], iteration_bounds = array<i64: 2>, scalar_prefetch = 0 : i64, scratch_operands = 1 : i64, tpu.core_type = #tpu.core_type<tc>, window_params = [{transform_indices = @transform_0, window_bounds = array<i64: 1, 18, 144>}, {pipeline_mode = #tpu.pipeline_mode<synchronous>, transform_indices = @transform_1, window_bounds = array<i64: 3, 144, 128>}, {pipeline_mode = #tpu.pipeline_mode<synchronous>, transform_indices = @transform_2, window_bounds = array<i64: 1, 128>}, {pipeline_mode = #tpu.pipeline_mode<synchronous>, transform_indices = @transform_3, window_bounds = array<i64: 3, 128, 128>}, {pipeline_mode = #tpu.pipeline_mode<synchronous>, transform_indices = @transform_4, window_bounds = array<i64: 1, 128>}, {pipeline_mode = #tpu.pipeline_mode<synchronous>, transform_indices = @transform_5, window_bounds = array<i64: 128, 256>}, {pipeline_mode = #tpu.pipeline_mode<synchronous>, transform_indices = @transform_6, window_bounds = array<i64: 1, 256>}, {transform_indices = @transform_7, window_bounds = array<i64: 1, 16, 128>}, {transform_indices = @transform_8, window_bounds = array<i64: 1, 16, 256>}]} {
    %cst = arith.constant 0.000000e+00 : f32
    %0 = vector.broadcast %cst : f32 to vector<16x128xf32>
    %c0 = arith.constant 0 : index
    %c0_0 = arith.constant 0 : index
    %c0_1 = arith.constant 0 : index
    %1 = vector.load %arg1[%c0, %c0_0, %c0_1] : memref<1x18x144xbf16, #tpu.memory_space<vmem>>, vector<1x16x144xbf16>
    %2 = vector.shape_cast %1 : vector<1x16x144xbf16> to vector<16x144xbf16>
    %c0_2 = arith.constant 0 : index
    %c0_3 = arith.constant 0 : index
    %c0_4 = arith.constant 0 : index
    %3 = vector.load %arg2[%c0_2, %c0_3, %c0_4] : memref<3x144x128xbf16, #tpu.memory_space<vmem>>, vector<1x144x128xbf16>
    %4 = vector.shape_cast %3 : vector<1x144x128xbf16> to vector<144x128xbf16>
    %cst_5 = arith.constant dense<0.000000e+00> : vector<16x128xf32>
    %5 = tpu.matmul %2, %4, %cst_5 {dimension_numbers = #tpu.dot_dimension_numbers<[1], [0], [0], [1], [0, 0, 1, 1], [], []>} : vector<16x144xbf16>, vector<144x128xbf16>, vector<16x128xf32> -> vector<16x128xf32>
    %6 = arith.addf %0, %5 : vector<16x128xf32>
    %c0_6 = arith.constant 0 : index
    %c1 = arith.constant 1 : index
    %c0_7 = arith.constant 0 : index
    %7 = vector.load %arg1[%c0_6, %c1, %c0_7] : memref<1x18x144xbf16, #tpu.memory_space<vmem>>, vector<1x16x144xbf16>
    %8 = vector.shape_cast %7 : vector<1x16x144xbf16> to vector<16x144xbf16>
    %c1_8 = arith.constant 1 : index
    %c0_9 = arith.constant 0 : index
    %c0_10 = arith.constant 0 : index
    %9 = vector.load %arg2[%c1_8, %c0_9, %c0_10] : memref<3x144x128xbf16, #tpu.memory_space<vmem>>, vector<1x144x128xbf16>
    %10 = vector.shape_cast %9 : vector<1x144x128xbf16> to vector<144x128xbf16>
    %cst_11 = arith.constant dense<0.000000e+00> : vector<16x128xf32>
    %11 = tpu.matmul %8, %10, %cst_11 {dimension_numbers = #tpu.dot_dimension_numbers<[1], [0], [0], [1], [0, 0, 1, 1], [], []>} : vector<16x144xbf16>, vector<144x128xbf16>, vector<16x128xf32> -> vector<16x128xf32>
    %12 = arith.addf %6, %11 : vector<16x128xf32>
    %c0_12 = arith.constant 0 : index
    %c2 = arith.constant 2 : index
    %c0_13 = arith.constant 0 : index
    %13 = vector.load %arg1[%c0_12, %c2, %c0_13] : memref<1x18x144xbf16, #tpu.memory_space<vmem>>, vector<1x16x144xbf16>
    %14 = vector.shape_cast %13 : vector<1x16x144xbf16> to vector<16x144xbf16>
    %c2_14 = arith.constant 2 : index
    %c0_15 = arith.constant 0 : index
    %c0_16 = arith.constant 0 : index
    %15 = vector.load %arg2[%c2_14, %c0_15, %c0_16] : memref<3x144x128xbf16, #tpu.memory_space<vmem>>, vector<1x144x128xbf16>
    %16 = vector.shape_cast %15 : vector<1x144x128xbf16> to vector<144x128xbf16>
    %cst_17 = arith.constant dense<0.000000e+00> : vector<16x128xf32>
    %17 = tpu.matmul %14, %16, %cst_17 {dimension_numbers = #tpu.dot_dimension_numbers<[1], [0], [0], [1], [0, 0, 1, 1], [], []>} : vector<16x144xbf16>, vector<144x128xbf16>, vector<16x128xf32> -> vector<16x128xf32>
    %18 = arith.addf %12, %17 : vector<16x128xf32>
    %c0_18 = arith.constant 0 : index
    %c0_19 = arith.constant 0 : index
    %19 = vector.load %arg3[%c0_18, %c0_19] : memref<1x128xf32, #tpu.memory_space<vmem>>, vector<1x128xf32>
    %20 = vector.broadcast %19 : vector<1x128xf32> to vector<16x128xf32>
    %21 = arith.addf %18, %20 : vector<16x128xf32>
    %cst_20 = arith.constant 0.000000e+00 : f32
    %22 = vector.broadcast %cst_20 : f32 to vector<16x128xf32>
    %23 = arith.maximumf %21, %22 : vector<16x128xf32>
    %24 = arith.truncf %23 : vector<16x128xf32> to vector<16x128xbf16>
    %c0_21 = arith.constant 0 : index
    %c0_22 = arith.constant 0 : index
    %c0_23 = arith.constant 0 : index
    %25 = vector.load %arg8[%c0_21, %c0_22, %c0_23] : memref<1x16x128xbf16, #tpu.memory_space<vmem>>, vector<1x16x128xbf16>
    %26 = vector.shape_cast %25 : vector<1x16x128xbf16> to vector<16x128xbf16>
    %27 = vector.shape_cast %24 : vector<16x128xbf16> to vector<1x16x128xbf16>
    tpu.vector_store %arg8[%c0_21, %c0_22, %c0_23], %27 {strides = array<i32>} : memref<1x16x128xbf16, #tpu.memory_space<vmem>>, vector<1x16x128xbf16>,
    %cst_24 = arith.constant 0.000000e+00 : bf16
    %28 = vector.broadcast %cst_24 : bf16 to vector<18x128xbf16>
    %c0_25 = arith.constant 0 : index
    %c0_26 = arith.constant 0 : index
    %29 = vector.load %arg10[%c0_25, %c0_26] : memref<18x128xbf16, #tpu.memory_space<vmem>>, vector<18x128xbf16>
    tpu.vector_store %arg10[%c0_25, %c0_26], %28 {strides = array<i32>} : memref<18x128xbf16, #tpu.memory_space<vmem>>, vector<18x128xbf16>,
    %c1_27 = arith.constant 1 : index
    %c0_28 = arith.constant 0 : index
    %30 = vector.load %arg10[%c1_27, %c0_28] : memref<18x128xbf16, #tpu.memory_space<vmem>>, vector<16x128xbf16>
    tpu.vector_store %arg10[%c1_27, %c0_28], %24 {strides = array<i32>} : memref<18x128xbf16, #tpu.memory_space<vmem>>, vector<16x128xbf16>,
    %cst_29 = arith.constant 0.000000e+00 : f32
    %31 = vector.broadcast %cst_29 : f32 to vector<16x128xf32>
    %c0_30 = arith.constant 0 : index
    %c0_31 = arith.constant 0 : index
    %32 = vector.load %arg10[%c0_30, %c0_31] : memref<18x128xbf16, #tpu.memory_space<vmem>>, vector<16x128xbf16>
    %c0_32 = arith.constant 0 : index
    %c0_33 = arith.constant 0 : index
    %c0_34 = arith.constant 0 : index
    %33 = vector.load %arg4[%c0_32, %c0_33, %c0_34] : memref<3x128x128xbf16, #tpu.memory_space<vmem>>, vector<1x128x128xbf16>
    %34 = vector.shape_cast %33 : vector<1x128x128xbf16> to vector<128x128xbf16>
    %cst_35 = arith.constant dense<0.000000e+00> : vector<16x128xf32>
    %35 = tpu.matmul %32, %34, %cst_35 {dimension_numbers = #tpu.dot_dimension_numbers<[1], [0], [0], [1], [0, 0, 1, 1], [], []>} : vector<16x128xbf16>, vector<128x128xbf16>, vector<16x128xf32> -> vector<16x128xf32>
    %36 = arith.addf %31, %35 : vector<16x128xf32>
    %c1_36 = arith.constant 1 : index
    %c0_37 = arith.constant 0 : index
    %37 = vector.load %arg10[%c1_36, %c0_37] : memref<18x128xbf16, #tpu.memory_space<vmem>>, vector<16x128xbf16>
    %c1_38 = arith.constant 1 : index
    %c0_39 = arith.constant 0 : index
    %c0_40 = arith.constant 0 : index
    %38 = vector.load %arg4[%c1_38, %c0_39, %c0_40] : memref<3x128x128xbf16, #tpu.memory_space<vmem>>, vector<1x128x128xbf16>
    %39 = vector.shape_cast %38 : vector<1x128x128xbf16> to vector<128x128xbf16>
    %cst_41 = arith.constant dense<0.000000e+00> : vector<16x128xf32>
    %40 = tpu.matmul %37, %39, %cst_41 {dimension_numbers = #tpu.dot_dimension_numbers<[1], [0], [0], [1], [0, 0, 1, 1], [], []>} : vector<16x128xbf16>, vector<128x128xbf16>, vector<16x128xf32> -> vector<16x128xf32>
    %41 = arith.addf %36, %40 : vector<16x128xf32>
    %c2_42 = arith.constant 2 : index
    %c0_43 = arith.constant 0 : index
    %42 = vector.load %arg10[%c2_42, %c0_43] : memref<18x128xbf16, #tpu.memory_space<vmem>>, vector<16x128xbf16>
    %c2_44 = arith.constant 2 : index
    %c0_45 = arith.constant 0 : index
    %c0_46 = arith.constant 0 : index
    %43 = vector.load %arg4[%c2_44, %c0_45, %c0_46] : memref<3x128x128xbf16, #tpu.memory_space<vmem>>, vector<1x128x128xbf16>
    %44 = vector.shape_cast %43 : vector<1x128x128xbf16> to vector<128x128xbf16>
    %cst_47 = arith.constant dense<0.000000e+00> : vector<16x128xf32>
    %45 = tpu.matmul %42, %44, %cst_47 {dimension_numbers = #tpu.dot_dimension_numbers<[1], [0], [0], [1], [0, 0, 1, 1], [], []>} : vector<16x128xbf16>, vector<128x128xbf16>, vector<16x128xf32> -> vector<16x128xf32>
    %46 = arith.addf %41, %45 : vector<16x128xf32>
    %c0_48 = arith.constant 0 : index
    %c0_49 = arith.constant 0 : index
    %47 = vector.load %arg5[%c0_48, %c0_49] : memref<1x128xf32, #tpu.memory_space<vmem>>, vector<1x128xf32>
    %48 = vector.broadcast %47 : vector<1x128xf32> to vector<16x128xf32>
    %49 = arith.addf %46, %48 : vector<16x128xf32>
    %cst_50 = arith.constant 0.000000e+00 : f32
    %50 = vector.broadcast %cst_50 : f32 to vector<16x128xf32>
    %51 = arith.maximumf %49, %50 : vector<16x128xf32>
    %52 = arith.truncf %51 : vector<16x128xf32> to vector<16x128xbf16>
    %c0_51 = arith.constant 0 : index
    %c0_52 = arith.constant 0 : index
    %53 = vector.load %arg6[%c0_51, %c0_52] : memref<128x256xbf16, #tpu.memory_space<vmem>>, vector<128x256xbf16>
    %cst_53 = arith.constant dense<0.000000e+00> : vector<16x256xf32>
    %54 = tpu.matmul %52, %53, %cst_53 {dimension_numbers = #tpu.dot_dimension_numbers<[1], [0], [0], [1], [0, 0, 1, 1], [], []>} : vector<16x128xbf16>, vector<128x256xbf16>, vector<16x256xf32> -> vector<16x256xf32>
    %c0_54 = arith.constant 0 : index
    %c0_55 = arith.constant 0 : index
    %55 = vector.load %arg7[%c0_54, %c0_55] : memref<1x256xf32, #tpu.memory_space<vmem>>, vector<1x256xf32>
    %56 = vector.broadcast %55 : vector<1x256xf32> to vector<16x256xf32>
    %57 = arith.addf %54, %56 : vector<16x256xf32>
    %c0_56 = arith.constant 0 : index
    %c0_57 = arith.constant 0 : index
    %c0_58 = arith.constant 0 : index
    %58 = vector.load %arg9[%c0_56, %c0_57, %c0_58] : memref<1x16x256xf32, #tpu.memory_space<vmem>>, vector<1x16x256xf32>
    %59 = vector.shape_cast %58 : vector<1x16x256xf32> to vector<16x256xf32>
    %60 = vector.shape_cast %57 : vector<16x256xf32> to vector<1x16x256xf32>
    tpu.vector_store %arg9[%c0_56, %c0_57, %c0_58], %60 {strides = array<i32>} : memref<1x16x256xf32, #tpu.memory_space<vmem>>, vector<1x16x256xf32>,
    return
  }
  func.func @transform_0(%arg0: i32) -> (i32, i32, i32) {
    %c0_i32 = arith.constant 0 : i32
    %c0_i32_0 = arith.constant 0 : i32
    %c0_i32_1 = arith.constant 0 : i32
    return %arg0, %c0_i32, %c0_i32_0 : i32, i32, i32
  }
  func.func @transform_1(%arg0: i32) -> (i32, i32, i32) {
    %c0_i32 = arith.constant 0 : i32
    %c0_i32_0 = arith.constant 0 : i32
    %c0_i32_1 = arith.constant 0 : i32
    %c0_i32_2 = arith.constant 0 : i32
    return %c0_i32, %c0_i32_0, %c0_i32_1 : i32, i32, i32
  }
  func.func @transform_2(%arg0: i32) -> (i32, i32) {
    %c0_i32 = arith.constant 0 : i32
    %c0_i32_0 = arith.constant 0 : i32
    %c0_i32_1 = arith.constant 0 : i32
    return %c0_i32, %c0_i32_0 : i32, i32
  }
  func.func @transform_3(%arg0: i32) -> (i32, i32, i32) {
    %c0_i32 = arith.constant 0 : i32
    %c0_i32_0 = arith.constant 0 : i32
    %c0_i32_1 = arith.constant 0 : i32
    %c0_i32_2 = arith.constant 0 : i32
    return %c0_i32, %c0_i32_0, %c0_i32_1 : i32, i32, i32
  }
  func.func @transform_4(%arg0: i32) -> (i32, i32) {
    %c0_i32 = arith.constant 0 : i32
    %c0_i32_0 = arith.constant 0 : i32
    %c0_i32_1 = arith.constant 0 : i32
    return %c0_i32, %c0_i32_0 : i32, i32
  }
  func.func @transform_5(%arg0: i32) -> (i32, i32) {
    %c0_i32 = arith.constant 0 : i32
    %c0_i32_0 = arith.constant 0 : i32
    %c0_i32_1 = arith.constant 0 : i32
    return %c0_i32, %c0_i32_0 : i32, i32
  }
  func.func @transform_6(%arg0: i32) -> (i32, i32) {
    %c0_i32 = arith.constant 0 : i32
    %c0_i32_0 = arith.constant 0 : i32
    %c0_i32_1 = arith.constant 0 : i32
    return %c0_i32, %c0_i32_0 : i32, i32
  }
  func.func @transform_7(%arg0: i32) -> (i32, i32, i32) {
    %c0_i32 = arith.constant 0 : i32
    %c0_i32_0 = arith.constant 0 : i32
    %c0_i32_1 = arith.constant 0 : i32
    return %arg0, %c0_i32, %c0_i32_0 : i32, i32, i32
  }
  func.func @transform_8(%arg0: i32) -> (i32, i32, i32) {
    %c0_i32 = arith.constant 0 : i32
    %c0_i32_0 = arith.constant 0 : i32
    %c0_i32_1 = arith.constant 0 : i32
    return %arg0, %c0_i32, %c0_i32_0 : i32, i32, i32
  }
}

</mosaic_0001>

<bundles_post_ra>
// kernel: tpu_custom_call.1
= control target key start
LH: loop header
LB: loop body
LE: loop exit
PB: predicated region body
PF: predicated region fallthrough
CT: control target
= control target key end

     0   :  { %14 = vsyncpa [#allocation4], 0  ;;  %s2402_s0 = inlined_call_operand.vmem [shape: bf16[2,18,144], index: 0, kind: input, shape index: {}]   ;;  %s2403_s1 = inlined_call_operand.hbm [shape: bf16[3,144,128], index: 1, kind: input, shape index: {}]   ;;  %s2404_s2 = inlined_call_operand.vmem [shape: f32[1,128], index: 2, kind: input, shape index: {}]   ;;  %s2405_s3 = inlined_call_operand.hbm [shape: bf16[3,128,128], index: 3, kind: input, shape index: {}]   ;;  %s2406_s4 = inlined_call_operand.vmem [shape: f32[1,128], index: 4, kind: input, shape index: {}]   ;;  %s2407_s5 = inlined_call_operand.hbm [shape: bf16[128,256], index: 5, kind: input, shape index: {}]   ;;  %s2408_s6 = inlined_call_operand.vmem [shape: f32[1,256], index: 6, kind: input, shape index: {}]   ;;  %s2409_s7 = inlined_call_operand.hbm [shape: bf16[2,16,128], index: 7, kind: output, shape index: {0}]   ;;  %s2410_s8 = inlined_call_operand.hbm [shape: f32[2,16,256], index: 8, kind: output, shape index: {1}]  }
   0x1   :  { %15 = vsyncpa [#allocation7], 0 }
   0x2   :  { %16 = vsyncpa [#allocation5], 0 }
   0x3   :  { %18 = vsyncpa [#allocation5 + $0x1], 0 }
   0x4   :  { %19 = vsyncpa [#allocation11], 0 }
   0x5   :  { %21 = vsyncpa [#allocation11 + $0x1], 0  ;;  %s2117_s27 = smov 0   ;;  %s2119_s28 = smov 0  }
   0x6   :  { %s2121_s29 = smov 0   ;;  %s2123_s30 = smov 0  }
   0x7 LB: > { %s2138_s9 = sadd.s32 4294967295, %s2054_s30   ;;  %s1507_s10 = sadd.s32 4294967294, %s2054_s30   ;;  %s2054_s30 = sphi %s2123_s30, %s2426_s30   ;;  %s2050_s29 = sphi %s2121_s29, %s2425_s29   ;;  %s2046_s28 = sphi %s2119_s28, %s2424_s28   ;;  %s2042_s27 = sphi %s2117_s27, %s2423_s27  }
   0x8   : > { %s2142_s11 = sadd.s32 1, %s2054_s30   ;;  %s186_s12 = sadd.s32 1, %s2050_s29 }
   0x9   : > { %s183_s13 = ssub.s32 %s2054_s30, %s2142_s11  ;;  %p196_p0 = scmp.ne.s32.totalorder %s2050_s29, %s2046_s28 }
   0xa   : > { %p184_p1 = scmp.eq.s32.totalorder %s183_s13, 0  ;;  %p197_p2 = scmp.eq.s32.totalorder %s2138_s9, 1 }
   0xb   : > { %p202_p3 = scmp.ne.s32.totalorder %s2046_s28, %s2042_s27  ;;  %p203_p4 = scmp.eq.s32.totalorder %s1507_s10, 1 }
   0xc   : > { %s2153_s14 = scalar_select %p184_p1, %s2050_s29, %s186_s12  }
   0xd   : > { %p2155_p5 = por %p197_p2, %p196_p0  ;;  %p2159_p6 = por %p203_p4, %p202_p3 }
   0xe   : > { %p1508_p7 = scmp.ge.s32.totalorder %s2054_s30, 1  ;;  %p236_p8 = scmp.lt.s32.totalorder %s2054_s30, 3 }
   0xf   : > { %s2413_s15 = scalar_select %p2155_p5, 1, 0 }
  0x10   : > { %s2414_s16 = scalar_select %p2159_p6, 1, 0 }
  0x11   : > { %p2411_p9 = scmp.eq.s32.totalorder %s2138_s9, 0  ;;  %p2166_p10 = pnand %p1508_p7, %p236_p8 }
  0x12   : > { %s2056_s18 = smov [#allocation6]   ;;  %s2057_s21 = smov [#allocation3]  }
  0x13   : > { %p1724_p11 = pneg %p2166_p10  ;;  %s264_s19 = sshll.u32 %s2056_s18, 4  ;;  %s265_s19 = int_to_ptr.vmem [resolvable:$true] %s264_s19 }
  0x14   : > { %s248_s22 = sshll.u32 %s2057_s21, 4  ;;  %s2058_s23 = smov [#allocation8]   ;;  %s249_s22 = int_to_ptr.vmem [resolvable:$true] %s248_s22 }
  0x15   : > { %p2174_p12 = pnand %p2411_p9, %p1724_p11  ;;  %s280_s24 = sshll.u32 %s2058_s23, 4  ;;  %s281_s24 = int_to_ptr.vmem [resolvable:$true] %s280_s24 }
  0x16   : > { %s1889_s25 = scalar_lea.vmem %s265_s19, 3072  ;;  %p1897_p3 = scmp.lt.s32.totalorder %s265_s19, %s265_s19 }
  0x17   : > { %p1880_p13 = pneg %p2174_p12  ;;  %p1890_p0 = scmp.ne.s32.totalorder %s265_s19, %s1889_s25 }
  0x18   : > { %p1898_p4 = scmp.lt.s32.totalorder %s1889_s25, %s1889_s25 }
  0x19   : > { %p1892_p1 = pnand %p1890_p0, %p1880_p13 }
  0x1a   : > { %p1899_p7 = por %p1898_p4, %p1897_p3 }
  0x1b   : > { %p1893_p2 = pneg %p1892_p1 }
  0x1d   : > { %p1900_p8 = pnand %p1899_p7, %p1893_p2 }
  0x1f   : > { %1903 = shalt.err (!%p1900_p8)
}
  0x20   : > { %s2059_s26 = smov 64   ;;  %s2060_s10 = smov 4  }
  0x21   : > { %1730 = dma.hbm_to_vmem [thread:$0]  (!%p2174_p12), %s2405_s3, 3072, %s265_s19, [#allocation7], %s2059_s26, %s2059_s26, %s2060_s10  }
  0x22   : > { %s1915_s18 = scalar_lea.vmem %s249_s22, 3456  ;;  %p1923_p9 = scmp.lt.s32.totalorder %s249_s22, %s249_s22 }
  0x23   : > { %p1916_p11 = scmp.ne.s32.totalorder %s249_s22, %s1915_s18  ;;  %p1924_p6 = scmp.lt.s32.totalorder %s1915_s18, %s1915_s18 }
  0x25   : > { %p1918_p0 = pnand %p1916_p11, %p1880_p13  ;;  %p1925_p3 = por %p1924_p6, %p1923_p9 }
  0x27   : > { %p1919_p1 = pneg %p1918_p0 }
  0x29   : > { %p1926_p2 = pnand %p1925_p3, %p1919_p1 }
  0x2b   : > { %1929 = shalt.err (!%p1926_p2)
}
  0x2c   : > { %1727 = dma.hbm_to_vmem [thread:$0]  (!%p2174_p12), %s2403_s1, 3456, %s249_s22, [#allocation4], %s2059_s26, %s2059_s26, %s2060_s10  }
  0x2d   : > { %s1941_s19 = scalar_lea.vmem %s281_s24, 2048  ;;  %p1949_p11 = scmp.lt.s32.totalorder %s281_s24, %s281_s24 }
  0x2e   : > { %p1942_p4 = scmp.ne.s32.totalorder %s281_s24, %s1941_s19  ;;  %p1950_p0 = scmp.lt.s32.totalorder %s1941_s19, %s1941_s19 }
  0x30   : > { %p1944_p7 = pnand %p1942_p4, %p1880_p13  ;;  %p1951_p5 = por %p1950_p0, %p1949_p11 }
  0x32   : > { %p1945_p8 = pneg %p1944_p7 }
  0x34   : > { %p1952_p6 = pnand %p1951_p5, %p1945_p8 }
  0x36   : > { %1955 = shalt.err (!%p1952_p6)
}
  0x37   : > { %s2061_s25 = smov 128   ;;  %s2062_s12 = smov 8  }
  0x38   : > { %1733 = dma.hbm_to_vmem [thread:$0]  (!%p2174_p12), %s2407_s5, 2048, %s281_s24, [#allocation7], %s2061_s25, %s2061_s25, %s2062_s12  }
  0x39   : > { %307 = sbr.rel (%p2166_p10) target bundleno = 822 (0x336), region = 48  ;;  %p2417_p9 = scmp.eq.s32.totalorder (!%p2166_p10), %s2138_s9, 0 }
  0x3e   : > { %2025 = dma.done.wait (%p2417_p9), [#allocation4], 3456   ;;  %p2418_p13 = pmov %p2417_p9 }
  0x3f   : > { %p2419_p5 = pmov %p2417_p9 }
  0x40   : > { %2027 = vsyncadd (%p2418_p13), [#allocation4], 4294963840 }
  0x41   : > { %2029 = dma.done.wait (%p2419_p5), [#allocation7], 5120   ;;  %p2420_p1 = pmov %p2419_p5 }
  0x42   : > { %v2063_v0 = vmov 0   ;;  %v1794_v1 = vld [vmem:[#allocation3 + $0x80] sm:$0xff]   ;;  %v1795_v2 = vld [vmem:[#allocation3 + $0x38] sm:$0xff]   ;;  %v1797_v4 = vld [vmem:[#allocation3 + $0x30] sm:$0xff]   ;;  %p354_p10 = scmp.lt.s32.totalorder %s2138_s9, 1  ;;  %vm493_vm0 = vcmask 130048  }
  0x43   : > { %2031 = vsyncadd (%p2420_p1), [#allocation7], 4294962176  ;;  %497 = vmatprep.subr.bf16.mxu0 %v2063_v0  ;;  %790 = vst [vmem:[#allocation2] sm:$0xf] %v2063_v0  ;;  %595 = vmatprep.subr.bf16.mxu1 %v2063_v0  ;;  %v1796_v3 = vld [vmem:[#allocation3 + $0x78] sm:$0xff]   ;;  %v1798_v5 = vld [vmem:[#allocation3 + $0x70] sm:$0xff]  }
  0x44   : > { %791 = vst [vmem:[#allocation2 + $0x4] sm:$0xf] %v2063_v0  ;;  %792 = vst [vmem:[#allocation2 + $0x8] sm:$0x1] %v2063_v0  ;;  %498 = vmatpush1.bf16.msra.mxu0 %v1794_v1  ;;  %596 = vmatpush1.bf16.msra.mxu1 %v1795_v2  ;;  %v1799_v6 = vld [vmem:[#allocation3 + $0x28] sm:$0xff]   ;;  %s355_s17 = scalar_select %p354_p10, %s2138_s9, 1 }
  0x45   : > { %499 = vmatprep.subr.bf16.mxu0 %v2063_v0  ;;  %597 = vmatprep.subr.bf16.mxu1 %v2063_v0  ;;  %v1800_v7 = vld [vmem:[#allocation3 + $0x68] sm:$0xff]   ;;  %v1801_v8 = vld [vmem:[#allocation3 + $0x20] sm:$0xff]   ;;  %v1803_v10 = vld [vmem:[#allocation3 + $0x18] sm:$0xff]   ;;  %vm413_vm1 = vsmask.f32 7424  ;;  %vm661_vm2 = vcmask 1046528  }
  0x46   : > { %s1707_s20 = smul.u32 24, %s355_s17  ;;  %v1802_v9 = vld [vmem:[#allocation3 + $0x60] sm:$0xff]   ;;  %v1804_v11 = vld [vmem:[#allocation3 + $0x58] sm:$0xff]   ;;  %v1805_v15 = vld [vmem:[#allocation3 + $0x10] sm:$0xff]   ;;  %v2064_v59 = vmov 0.0   ;;  %vm2065_vm3 = vmmov 0  }
  0x47   : > { %v1806_v23 = vld [vmem:[#allocation3 + $0x50] sm:$0xff]   ;;  %v1807_v24 = vld [vmem:[#allocation3 + $0x8] sm:$0xff]   ;;  %v1809_v33 = vld [vmem:[#allocation3] sm:$0xff]   ;;  %s2297_s23 = sand.u32 1, %s2046_s28   ;;  %vm816_vm4 = vcmask 1043456   ;;  %vm823_vm9 = vcmask 1040384  }
  0x48   : > { %500 = vmatpush1.bf16.msra.mxu0 %v1796_v3  ;;  %598 = vmatpush1.bf16.msra.mxu1 %v1797_v4  ;;  %s2231_s26 = scalar_lea.vmem %s2402_s0, %s1707_s20  ;;  %v1808_v28 = vld [vmem:[#allocation3 + $0x48] sm:$0xff]   ;;  %v1811_v36 = vld [vmem:[#allocation3 + $0x40] sm:$0xff]   ;;  %v1818_v47 = vld [vmem:[#allocation3 + $0xb8] sm:$0xff]   ;;  %s1517_s19 = sshll.u32 %s2297_s23, 3  ;;  %vm817_vm5 = vsmask.f32 7938 }
  0x49   : > { %501 = vmatprep.subr.bf16.mxu0 %v2063_v0  ;;  %599 = vmatprep.subr.bf16.mxu1 %v2063_v0  ;;  %v360_v12 = vld [vmem:[%s2231_s26] sm:$0xff]  ;;  %v2236_v13 = vld [vmem:[%s2231_s26 + $0x8] sm:$0xff]  ;;  %v380_v14 = vld [vmem:[%s2231_s26 + $0x10] sm:$0x11]  ;;  %vm793_vm7 = vsmask.f32 256 }
  0x4a   : > { %v1521_v16 = vcombine.high %v360_v12, %v2236_v13  ;;  %v1523_v17 = vcombine.high %v380_v14, %v380_v14  ;;  %v1520_v18 = vcombine.low %v360_v12, %v2236_v13  ;;  %v2244_v22 = vcombine.low %v380_v14, %v380_v14  ;;  %v1810_v35 = vld [vmem:[#allocation3 + $0x88] sm:$0xff]   ;;  %v636_v38 = vld [vmem:[%s2231_s26] sm:$0xee]  ;;  %v1817_v45 = vld [vmem:[#allocation3 + $0xc0] sm:$0xff]   ;;  %s2300_s25 = scalar_lea.vmem [#allocation9], %s1517_s19  ;;  %s1613_s18 = sshll.u32 %s2138_s9, 7 }
  0x4b   : > { %v1545_v40 = vcombine.high %v636_v38, %v2236_v13  ;;  %v1816_v41 = vld [vmem:[#allocation3 + $0xc8] sm:$0xff]   ;;  %v1819_v48 = vld [vmem:[#allocation3 + $0xb0] sm:$0xff]   ;;  %v1821_v50 = vld [vmem:[#allocation3 + $0xa0] sm:$0xff]   ;;  %v1544_v53 = vcombine.low %v636_v38, %v2236_v13  ;;  %vm794_vm8 = vsmask.f32 4368  ;;  %s2322_s22 = scalar_lea.hbm %s2409_s7, %s1613_s18  ;;  %s1366_s24 = sshll.u32 %s2300_s25, 4  ;;  %s2325_s24 = int_to_ptr.vmem [resolvable:$true] %s1366_s24 }
  0x4c   : > { %502 = vmatpush1.bf16.msra.mxu0 %v1798_v5  ;;  %600 = vmatpush1.bf16.msra.mxu1 %v1799_v6  ;;  %v427_v19 = vshrl.u32 %v1521_v16, 16  ;;  %v429_v20 = vshll.u32 %v1521_v16, 16  ;;  %v434_v21 = vshll.u32 %v1523_v17, 16  ;;  %v417_v25 = vshll.u32 %v1520_v18, 16  ;;  %v1820_v49 = vld [vmem:[#allocation3 + $0xa8] sm:$0xff]   ;;  %v1822_v51 = vld [vmem:[#allocation3 + $0x98] sm:$0xff]   ;;  %vm818_vm6 = vmand %vm816_vm4, %vm817_vm5 }
  0x4d   : > { %503 = vmatprep.subr.bf16.mxu0 %v2063_v0  ;;  %601 = vmatprep.subr.bf16.mxu1 %v2063_v0  ;;  %v422_v30 = vshll.u32 %v2244_v22, 16  ;;  %v415_v31 = vshrl.u32 %v1520_v18, 16  ;;  %v665_v42 = vrot.slane %v1545_v40, 1  ;;  %v666_v43 = vrot.slane %v1523_v17, 1  ;;  %v1823_v52 = vld [vmem:[#allocation3 + $0x90] sm:$0xff]   ;;  %v1829_v61 = vld [vmem:[#allocation6 + $0xb0] sm:$0xff]   ;;  %vm795_vm10 = vmor %vm793_vm7, %vm794_vm8 }
  0x4e   : > { %1543 = vmatprep.mubr.msk.bf16.mxu1 %vm493_vm0, %v1521_v16  ;;  %v431_v26 = vrot.slane %v429_v20, 1  ;;  %v436_v27 = vrot.slane %v434_v21, 1  ;;  %v419_v32 = vrot.slane %v417_v25, 1  ;;  %v1824_v54 = vld [vmem:[#allocation3 + $0xd0] sm:$0xff]   ;;  %v662_v55 = vrot.slane %v1544_v53, 1  ;;  %v1830_v62 = vld [vmem:[#allocation6 + $0x70] sm:$0xff]   ;;  %vm824_vm11 = vmand %vm823_vm9, %vm793_vm7 }
  0x4f   : > { %v424_v37 = vrot.slane %v422_v30, 1  ;;  %v667_v46 = vsel %vm661_vm2, %v665_v42, %v666_v43  ;;  %v663_v56 = vrot.slane %v2244_v22, 1  ;;  %v1827_v58 = vld [vmem:[#allocation6 + $0xb8] sm:$0xff]   ;;  %v1831_v63 = vld [vmem:[#allocation6 + $0xa8] sm:$0xff]   ;;  %v1833_v2 = vld [vmem:[#allocation6 + $0xa0] sm:$0xff]   ;;  %s1348_s26 = scalar_lea.sflag [#allocation5], %s2297_s23 }
  0x50   : > { %504 = vmatpush1.bf16.msra.mxu0 %v1800_v7  ;;  %602 = vmatpush1.bf16.msra.mxu1 %v1801_v8  ;;  %v432_v29 = vor.u32 %v431_v26, %v427_v19  ;;  %v420_v39 = vor.u32 %v419_v32, %v415_v31  ;;  %v1828_v60 = vld [vmem:[#allocation6 + $0x78] sm:$0xff]   ;;  %v1832_v1 = vld [vmem:[#allocation6 + $0x68] sm:$0xff]   ;;  %v1834_v3 = vld [vmem:[#allocation6 + $0x60] sm:$0xff]   ;;  %s1956_s10 = scalar_lea.vmem %s2325_s24, 128  ;;  %p2421_p3 = scmp.ne.s32.totalorder %s2413_s15, 0 }
  0x51   : > { %505 = vmatprep.subr.bf16.mxu0 %v2063_v0  ;;  %603 = vmatprep.subr.bf16.mxu1 %v2063_v0  ;;  %v664_v57 = vsel %vm661_vm2, %v662_v55, %v663_v56  ;;  %v1835_v4 = vld [vmem:[#allocation6 + $0x98] sm:$0xff]   ;;  %v1837_v6 = vld [vmem:[#allocation6 + $0x90] sm:$0xff]   ;;  %v1839_v8 = vld [vmem:[#allocation6 + $0x88] sm:$0xff]   ;;  %p1957_p12 = scmp.ne.s32.totalorder %s2325_s24, %s1956_s10  ;;  %s2066_s21 = smov [#allocation9]  }
  0x52   : > { %v437_v34 = vsel %vm413_vm1, %v432_v29, %v436_v27  ;;  %v425_v44 = vsel %vm413_vm1, %v420_v39, %v424_v37  ;;  %v1836_v5 = vld [vmem:[#allocation6 + $0x58] sm:$0xff]   ;;  %v1838_v7 = vld [vmem:[#allocation6 + $0x50] sm:$0xff]   ;;  %s1960_s19 = sshll.u32 %s2066_s21, 4  ;;  %s1961_s19 = int_to_ptr.vmem [resolvable:$false] %s1960_s19 }
  0x53   : > { %1533 = vmatprep.mubr.msk.bf16.mxu0 %vm493_vm0, %v437_v34  ;;  %v1556_v22 = vld [vmem:[%s2404_s2] ss:$0 sm:$0xff]  ;;  %p1958_p2 = pnand %p1957_p12, %p2421_p3  ;;  %s1962_s12 = scalar_lea.vmem %s1961_s19, 256 }
  0x54   : > { %506 = vmatpush1.bf16.msra.mxu0 %v1802_v9  ;;  %604 = vmatpush1.bf16.msra.mxu1 %v1803_v10  ;;  %v1840_v9 = vld [vmem:[#allocation6 + $0x48] sm:$0xff]   ;;  %v1841_v10 = vld [vmem:[#allocation6 + $0x80] sm:$0xff]   ;;  %v819_v39 = vld [vmem:[#allocation2] sm:$0xf]  ;;  %p1963_p7 = scmp.lt.s32.totalorder %s2325_s24, %s1961_s19  ;;  %p1964_p8 = scmp.lt.s32.totalorder %s1962_s12, %s1956_s10 }
  0x55   : > { %507 = vmatprep.subr.bf16.mxu0 %v2063_v0  ;;  %605 = vmatprep.subr.bf16.mxu1 %v2063_v0  ;;  %p1959_p4 = pneg %p1958_p2 }
  0x56   : > { %p1965_p11 = por %p1964_p8, %p1963_p7 }
  0x58   : > { %508 = vmatpush1.bf16.msra.mxu0 %v1804_v11  ;;  %606 = vmatpush1.bf16.msra.mxu1 %v1805_v15  ;;  %v1842_v11 = vld [vmem:[#allocation6 + $0x40] sm:$0xff]   ;;  %p1966_p0 = pnand %p1965_p11, %p1959_p4 }
  0x59   : > { %509 = vmatprep.subr.bf16.mxu0 %v2063_v0  ;;  %607 = vmatprep.subr.bf16.mxu1 %v2063_v0 }
  0x5c   : > { %510 = vmatpush1.bf16.msra.mxu0 %v1806_v23  ;;  %608 = vmatpush1.bf16.msra.mxu1 %v1807_v24 }
  0x5d   : > { %511 = vmatprep.subr.bf16.mxu0 %v2063_v0  ;;  %609 = vmatprep.subr.bf16.mxu1 %v2063_v0 }
  0x60   : > { %512 = vmatpush1.bf16.msra.mxu0 %v1808_v28  ;;  %610 = vmatpush1.bf16.msra.mxu1 %v1809_v33 }
  0x61   : > { %527 = vmatprep.subr.bf16.mxu0 %v2063_v0  ;;  %625 = vmatprep.subr.bf16.mxu1 %v2063_v0 }
  0x64   : > { %528 = vmatpush2.bf16.msra.mxu0 %v1810_v35  ;;  %626 = vmatpush2.bf16.msra.mxu1 %v1811_v36 }
  0x65   : > { %726 = vmatprep.subr.bf16.mxu0 %v2063_v0  ;;  %1647 = vmatprep.subr.bf16.mxu1 %v2064_v59 }
  0x67   : > { %530 = vmatmul.mubr.bf16.vlgmr.msra.gmra.mxu0 %v425_v44  ;;  %628 = vmatmul.mubr.bf16.vlgmr.msra.gmra.mxu1 %v1520_v18 }
  0x68   : > { %727 = vmatpush1.bf16.msra.mxu0 %v1816_v41  ;;  %1555 = vmatprep.mubr.msk.bf16.mxu0 %vm493_vm0, %v667_v46 }
  0x69   : > { %728 = vmatprep.subr.bf16.mxu0 %v2063_v0  ;;  %1648 = vmatpush3.bf16.msra.mxu1 %v1828_v60 }
  0x6a   : > { %1649 = vmatprep.subr.bf16.mxu1 %v2064_v59  ;;  %1663 = vmatprep.mubr.msk.bf16.mxu1 %vm2065_vm3, %v2064_v59 }
  0x6c   : > { %729 = vmatpush1.bf16.msra.mxu0 %v1817_v45  ;;  %v825_v45 = vld [vmem:[#allocation2 + $0x8] sm:$0x1] }
  0x6d   : > { %730 = vmatprep.subr.bf16.mxu0 %v2063_v0  ;;  %1650 = vmatpush3.bf16.msra.mxu1 %v1830_v62 }
  0x6e   : > { %1651 = vmatprep.subr.bf16.mxu1 %v2064_v59 }
  0x70   : > { %731 = vmatpush1.bf16.msra.mxu0 %v1818_v47 }
  0x71   : > { %732 = vmatprep.subr.bf16.mxu0 %v2063_v0  ;;  %1652 = vmatpush3.bf16.msra.mxu1 %v1832_v1 }
  0x72   : > { %1653 = vmatprep.subr.bf16.mxu1 %v2064_v59 }
  0x74   : > { %733 = vmatpush1.bf16.msra.mxu0 %v1819_v48 }
  0x75   : > { %734 = vmatprep.subr.bf16.mxu0 %v2063_v0  ;;  %1654 = vmatpush3.bf16.msra.mxu1 %v1834_v3 }
  0x76   : > { %1655 = vmatprep.subr.bf16.mxu1 %v2064_v59 }
  0x78   : > { %735 = vmatpush1.bf16.msra.mxu0 %v1820_v49 }
  0x79   : > { %736 = vmatprep.subr.bf16.mxu0 %v2063_v0  ;;  %1656 = vmatpush3.bf16.msra.mxu1 %v1836_v5 }
  0x7a   : > { %1657 = vmatprep.subr.bf16.mxu1 %v2064_v59 }
  0x7c   : > { %737 = vmatpush1.bf16.msra.mxu0 %v1821_v50 }
  0x7d   : > { %738 = vmatprep.subr.bf16.mxu0 %v2063_v0  ;;  %1658 = vmatpush3.bf16.msra.mxu1 %v1838_v7  ;;  %v1848_v7 = vld [vmem:[#allocation6 + $0x28] sm:$0xff]  }
  0x7e   : > { %1659 = vmatprep.subr.bf16.mxu1 %v2064_v59 }
  0x80   : > { %739 = vmatpush1.bf16.msra.mxu0 %v1822_v51 }
  0x81   : > { %740 = vmatprep.subr.bf16.mxu0 %v2063_v0  ;;  %1660 = vmatpush3.bf16.msra.mxu1 %v1840_v9  ;;  %v1850_v9 = vld [vmem:[#allocation6 + $0x18] sm:$0xff]  }
  0x82   : > { %1661 = vmatprep.subr.bf16.mxu1 %v2064_v59 }
  0x84   : > { %741 = vmatpush1.bf16.msra.mxu0 %v1823_v52 }
  0x85   : > { %756 = vmatprep.subr.bf16.mxu0 %v2063_v0  ;;  %1662 = vmatpush3.bf16.msra.mxu1 %v1842_v11  ;;  %v1852_v11 = vld [vmem:[#allocation6 + $0x8] sm:$0xff]  }
  0x86   : > { %1667 = vmatprep.subr.bf16.mxu1 %v2064_v59 }
  0x88   : > { %757 = vmatpush2.bf16.msra.mxu0 %v1824_v54 }
  0x89   : > { %1687 = vmatprep.subr.bf16.mxu0 %v2064_v59 }
  0x8b   : > { %759 = vmatmul.mubr.bf16.vlgmr.msra.gmra.mxu0 %v664_v57 }
  0x8c   : > { %1688 = vmatpush3.bf16.msra.mxu0 %v1827_v58  ;;  %1703 = vmatprep.mubr.msk.bf16.mxu0 %vm2065_vm3, %v2064_v59 }
  0x8d   : > { %1689 = vmatprep.subr.bf16.mxu0 %v2064_v59 }
  0x90   : > { %1690 = vmatpush3.bf16.msra.mxu0 %v1829_v61 }
  0x91   : > { %1691 = vmatprep.subr.bf16.mxu0 %v2064_v59 }
  0x94   : > { %1692 = vmatpush3.bf16.msra.mxu0 %v1831_v63 }
  0x95   : > { %1693 = vmatprep.subr.bf16.mxu0 %v2064_v59 }
  0x98   : > { %1694 = vmatpush3.bf16.msra.mxu0 %v1833_v2 }
  0x99   : > { %1695 = vmatprep.subr.bf16.mxu0 %v2064_v59 }
  0x9c   : > { %1696 = vmatpush3.bf16.msra.mxu0 %v1835_v4  ;;  %v1846_v4 = vld [vmem:[#allocation6 + $0x38] sm:$0xff]  }
  0x9d   : > { %1697 = vmatprep.subr.bf16.mxu0 %v2064_v59 }
  0xa0   : > { %1698 = vmatpush3.bf16.msra.mxu0 %v1837_v6  ;;  %v1847_v6 = vld [vmem:[#allocation6 + $0x30] sm:$0xff]  }
  0xa1   : > { %1699 = vmatprep.subr.bf16.mxu0 %v2064_v59 }
  0xa4   : > { %1700 = vmatpush3.bf16.msra.mxu0 %v1839_v8  ;;  %v1849_v8 = vld [vmem:[#allocation6 + $0x20] sm:$0xff]  }
  0xa5   : > { %1701 = vmatprep.subr.bf16.mxu0 %v2064_v59 }
  0xa8   : > { %1702 = vmatpush3.bf16.msra.mxu0 %v1841_v10  ;;  %v1851_v10 = vld [vmem:[#allocation6 + $0x10] sm:$0xff]  }
 0x127   : > { %v531_v12 = vpop.f32.mrf.mxu0  ;;  %v629_v13 = vpop.f32.mrf.mxu1 }
 0x128   : > { %v630_v20 = vadd.f32 %v629_v13, %v531_v12  ;;  %v1853_v12 = vld [vmem:[#allocation6] sm:$0xff]   ;;  %v1854_v13 = vld [vmem:[#allocation8 + $0x70] ss:$8 sps:$4 sm:$0xff]  }
 0x129   : > { %v533_v14 = vpop.f32.mrf.mxu0  ;;  %v631_v15 = vpop.f32.mrf.mxu1 }
 0x12a   : > { %v1856_v14 = vld [vmem:[#allocation8 + $0x74] ss:$8 sps:$4 sm:$0xff]   ;;  %v1859_v15 = vld [vmem:[#allocation8 + $0x64] ss:$8 sps:$4 sm:$0xff]  }
 0x12b   : > { %v534_v16 = vpop.f32.mrf.mxu0  ;;  %v632_v17 = vpop.f32.mrf.mxu1 }
 0x12c   : > { %v633_v25 = vadd.f32 %v632_v17, %v534_v16  ;;  %v1857_v16 = vld [vmem:[#allocation8 + $0x60] ss:$8 sps:$4 sm:$0xff]   ;;  %v1862_v17 = vld [vmem:[#allocation8 + $0x54] ss:$8 sps:$4 sm:$0xff]  }
 0x12d   : > { %v536_v18 = vpop.f32.mrf.mxu0  ;;  %v634_v19 = vpop.f32.mrf.mxu1 }
 0x12e   : > { %v1860_v18 = vld [vmem:[#allocation8 + $0x50] ss:$8 sps:$4 sm:$0xff]   ;;  %v1865_v19 = vld [vmem:[#allocation8 + $0x44] ss:$8 sps:$4 sm:$0xff]  }
 0x14b   : > { %v760_v21 = vpop.f32.mrf.mxu0 }
 0x14c   : > { %v767_v23 = vadd.f32 %v760_v21, %v630_v20  ;;  %v1863_v20 = vld [vmem:[#allocation8 + $0x40] ss:$8 sps:$4 sm:$0xff]   ;;  %v1866_v21 = vld [vmem:[#allocation8 + $0x30] ss:$8 sps:$4 sm:$0xff]  }
 0x14d   : > { %v762_v24 = vpop.f32.mrf.mxu0 }
 0x14e   : > { %v776_v26 = vadd.f32 %v1556_v22, %v767_v23  ;;  %v1874_v23 = vld [vmem:[#allocation8 + $0x14] ss:$8 sps:$4 sm:$0xff]   ;;  %v1872_v24 = vld [vmem:[#allocation8 + $0x10] ss:$8 sps:$4 sm:$0xff]  }
 0x14f   : > { %v763_v27 = vpop.f32.mrf.mxu0 }
 0x150   : > { %v778_v28 = vmax.f32 %v776_v26, 0.0  ;;  %v768_v29 = vadd.f32 %v763_v27, %v633_v25  ;;  %v1877_v25 = vld [vmem:[#allocation8 + $0x4] ss:$8 sps:$4 sm:$0xff]   ;;  %v1875_v26 = vld [vmem:[#allocation8] ss:$8 sps:$4 sm:$0xff]  }
 0x151   : > { %v765_v30 = vpop.f32.mrf.mxu0 }
 0x152   : > { %v1611_v31 = vpack.c.bf16 %v778_v28, %v778_v28  ;;  %v777_v32 = vadd.f32 %v1556_v22, %v768_v29  ;;  %v1869_v22 = vld [vmem:[#allocation8 + $0x20] ss:$8 sps:$4 sm:$0xff]  }
 0x154   : > { %v797_v33 = vshrl.u32 %v1611_v31, 16  ;;  %v779_v34 = vmax.f32 %v777_v32, 0.0  ;;  %v800_v36 = vshll.u32 %v1611_v31, 16 }
 0x156   : > { %v799_v35 = vrot.slane %v797_v33, 7  ;;  %v1612_v37 = vpack.c.bf16 %v779_v34, %v779_v34  ;;  %v1618_v38 = vpack.c.bf16 %v779_v34, %v778_v28 }
 0x158   : > { %v802_v40 = vor.u32 %v800_v36, %v799_v35  ;;  %1619 = vst [vmem:[%s2300_s25] sm:$0xff] %v1618_v38   ;;  %v805_v41 = vshrl.u32 %v1612_v37, 16  ;;  %v808_v44 = vshll.u32 %v1612_v37, 16  ;;  %v803_v46 = vrot.slane %v799_v35, 4 }
 0x15a   : > { %v820_v42 = vsel %vm818_vm6, %v802_v40, %v819_v39  ;;  %v807_v43 = vrot.slane %v805_v41, 7  ;;  %v1586_v39 = vld [vmem:[%s2406_s4] ss:$0 sm:$0xff] }
 0x15b   : > { %821 = vst [vmem:[#allocation2] sm:$0xf] %v820_v42 }
 0x15c   : > { %v810_v47 = vor.u32 %v808_v44, %v807_v43  ;;  %v812_v48 = vrot.slane %v807_v43, 4 }
 0x15e   : > { %v811_v49 = vsel %vm795_vm10, %v803_v46, %v810_v47  ;;  %v826_v50 = vsel %vm824_vm11, %v812_v48, %v825_v45 }
 0x15f   : > { %822 = vst [vmem:[#allocation2 + $0x4] sm:$0xf] %v811_v49  ;;  %827 = vst [vmem:[#allocation2 + $0x8] sm:$0x1] %v826_v50 }
 0x162   : > { %v828_v51 = vld [vmem:[#allocation2] sm:$0xf] }
 0x163   : > { %v1064_v53 = vld [vmem:[#allocation2] sm:$0xe] }
 0x166   : > { %v829_v52 = vld [vmem:[#allocation2 + $0x4] sm:$0xf]  ;;  %v1844_v55 = vld [vmem:[#allocation2 + $0x8] ss:$0 sps:$4 sm:$0x11]  }
 0x167   : > { %v1559_v54 = vcombine.low %v828_v51, %v829_v52  ;;  %v1577_v56 = vcombine.low %v1064_v53, %v829_v52  ;;  %v1086_v58 = vrot.slane %v1844_v55, 1  ;;  %v880_v61 = vshll.u32 %v1844_v55, 16 }
 0x169   : > { %v1085_v57 = vrot.slane %v1577_v56, 1  ;;  %v875_v60 = vshll.u32 %v1559_v54, 16  ;;  %v873_v63 = vshrl.u32 %v1559_v54, 16  ;;  %v882_v3 = vrot.slane %v880_v61, 1 }
 0x16b   : > { %v1087_v62 = vsel %vm661_vm2, %v1085_v57, %v1086_v58  ;;  %v877_v1 = vrot.slane %v875_v60, 1 }
 0x16c   : > { %1704 = vmatmul.mubr.bf16.vlgmr.msra.gmra.mxu0 %v1087_v62 }
 0x16d   : > { %v878_v2 = vor.u32 %v877_v1, %v873_v63 }
 0x16f   : > { %v883_v5 = vsel %vm413_vm1, %v878_v2, %v882_v3 }
 0x170   : > { %1664 = vmatmul.mubr.bf16.vlgmr.msra.gmra.mxu1 %v883_v5 }
 0x171   : > { %1668 = vmatpush3.bf16.msra.mxu1 %v1846_v4  ;;  %1683 = vmatprep.mubr.msk.bf16.mxu1 %vm2065_vm3, %v2064_v59 }
 0x172   : > { %1669 = vmatprep.subr.bf16.mxu1 %v2064_v59 }
 0x175   : > { %1670 = vmatpush3.bf16.msra.mxu1 %v1847_v6 }
 0x176   : > { %1671 = vmatprep.subr.bf16.mxu1 %v2064_v59 }
 0x179   : > { %1672 = vmatpush3.bf16.msra.mxu1 %v1848_v7 }
 0x17a   : > { %1673 = vmatprep.subr.bf16.mxu1 %v2064_v59 }
 0x17d   : > { %1674 = vmatpush3.bf16.msra.mxu1 %v1849_v8 }
 0x17e   : > { %1675 = vmatprep.subr.bf16.mxu1 %v2064_v59 }
 0x181   : > { %1676 = vmatpush3.bf16.msra.mxu1 %v1850_v9 }
 0x182   : > { %1677 = vmatprep.subr.bf16.mxu1 %v2064_v59 }
 0x185   : > { %1678 = vmatpush3.bf16.msra.mxu1 %v1851_v10 }
 0x186   : > { %1679 = vmatprep.subr.bf16.mxu1 %v2064_v59 }
 0x189   : > { %1680 = vmatpush3.bf16.msra.mxu1 %v1852_v11 }
 0x18a   : > { %1681 = vmatprep.subr.bf16.mxu1 %v2064_v59  ;;  %v1868_v59 = vld [vmem:[#allocation8 + $0x34] ss:$8 sps:$4 sm:$0xff]  }
 0x18d   : > { %1682 = vmatpush3.bf16.msra.mxu1 %v1853_v12 }
 0x18e   : > { %1300 = vmatprep.subr.bf16.mxu1 %v1856_v14 }
 0x190   : > { %1684 = vmatmul.mubr.bf16.vlgmr.msra.gmra.mxu1 %v1559_v54 }
 0x191   : > { %1332 = vmatprep.mubr.bf16.mxu1 %v2063_v0  ;;  %1301 = vmatpush1.bf16.msra.mxu1 %v1854_v13  ;;  %v1871_v0 = vld [vmem:[#allocation8 + $0x24] ss:$8 sps:$4 sm:$0xff]  }
 0x192   : > { %1302 = vmatprep.subr.bf16.mxu1 %v1859_v15 }
 0x195   : > { %1303 = vmatpush1.bf16.msra.mxu1 %v1857_v16 }
 0x196   : > { %1304 = vmatprep.subr.bf16.mxu1 %v1862_v17 }
 0x199   : > { %1305 = vmatpush1.bf16.msra.mxu1 %v1860_v18 }
 0x19a   : > { %1306 = vmatprep.subr.bf16.mxu1 %v1865_v19 }
 0x19d   : > { %1307 = vmatpush1.bf16.msra.mxu1 %v1863_v20 }
 0x19e   : > { %1308 = vmatprep.subr.bf16.mxu1 %v1868_v59 }
 0x1a1   : > { %1309 = vmatpush1.bf16.msra.mxu1 %v1866_v21 }
 0x1a2   : > { %1310 = vmatprep.subr.bf16.mxu1 %v1871_v0 }
 0x1a5   : > { %1311 = vmatpush1.bf16.msra.mxu1 %v1869_v22 }
 0x1a6   : > { %1312 = vmatprep.subr.bf16.mxu1 %v1874_v23 }
 0x1a9   : > { %1313 = vmatpush1.bf16.msra.mxu1 %v1872_v24 }
 0x1aa   : > { %1314 = vmatprep.subr.bf16.mxu1 %v1877_v25 }
 0x1ad   : > { %1315 = vmatpush1.bf16.msra.mxu1 %v1875_v26 }
 0x22c   : > { %v1171_v27 = vpop.f32.mrf.mxu0 }
 0x22e   : > { %v1705_v28 = vpop.f32.mrf.mxu0 }
 0x230   : > { %v967_v29 = vpop.f32.mrf.mxu1  ;;  %v1174_v30 = vpop.f32.mrf.mxu0 }
 0x232   : > { %v1665_v31 = vpop.f32.mrf.mxu1  ;;  %v1706_v32 = vpop.f32.mrf.mxu0 }
 0x234   : > { %v970_v33 = vpop.f32.mrf.mxu1 }
 0x236   : > { %v1666_v34 = vpop.f32.mrf.mxu1 }
 0x250   : > { %v1057_v35 = vpop.f32.mrf.mxu1 }
 0x251   : > { %v1058_v36 = vadd.f32 %v1057_v35, %v967_v29 }
 0x252   : > { %v1685_v37 = vpop.f32.mrf.mxu1 }
 0x253   : > { %v1178_v38 = vadd.f32 %v1171_v27, %v1058_v36 }
 0x254   : > { %v1060_v40 = vpop.f32.mrf.mxu1 }
 0x255   : > { %v1061_v41 = vadd.f32 %v1060_v40, %v970_v33  ;;  %v1187_v43 = vadd.f32 %v1586_v39, %v1178_v38 }
 0x256   : > { %v1686_v42 = vpop.f32.mrf.mxu1 }
 0x257   : > { %v1179_v44 = vadd.f32 %v1174_v30, %v1061_v41  ;;  %v1189_v46 = vmax.f32 %v1187_v43, 0.0 }
 0x259   : > { %v1188_v45 = vadd.f32 %v1586_v39, %v1179_v44 }
 0x25b   : > { %v1190_v47 = vmax.f32 %v1188_v45, 0.0 }
 0x25d   : > { %v1191_v48 = vpack.c.bf16 %v1190_v47, %v1189_v46 }
 0x25f   : > { %1333 = vmatmul.mubr.bf16.vlgmr.msra.gmra.mxu1 %v1191_v48 }
 0x260   : > { %1969 = shalt.err (!%p1966_p0)
}
 0x261   : > { %s1970_s25 = scalar_lea.hbm %s2322_s22, 128  ;;  %s1974_s17 = scalar_lea.hbm %s2409_s7, 256 }
 0x262   : > { %p1971_p6 = scmp.ne.s32.totalorder %s2322_s22, %s1970_s25  ;;  %p1975_p5 = scmp.lt.s32.totalorder %s2322_s22, %s2409_s7 }
 0x263   : > { %p1976_p1 = scmp.lt.s32.totalorder %s1974_s17, %s1970_s25 }
 0x264   : > { %p1972_p9 = pnand %p1971_p6, %p2421_p3 }
 0x265   : > { %p1977_p10 = por %p1976_p1, %p1975_p5 }
 0x266   : > { %p1973_p13 = pneg %p1972_p9 }
 0x268   : > { %p1978_p12 = pnand %p1977_p10, %p1973_p13 }
 0x26a   : > { %1981 = shalt.err (!%p1978_p12)
}
 0x26b   : > { %s2067_s10 = smov 64   ;;  %s2068_s19 = smov 4   ;;  %v1210_v49 = vlaneseq  ;;  %v1208_v52 = vld [vmem:[%s2408_s6] sm:$0x3] }
 0x26c   : > { %1720 = dma.vmem_to_hbm [thread:$0]  (%p2421_p3), %s2325_s24, 128, %s2322_s22, %s1348_s26, %s2067_s10, %s2067_s10, %s2068_s19  }
 0x26d   : > { %v1211_v50 = vshrl.u32 %v1210_v49, 7  ;;  %s1518_s25 = sshll.u32 %s2297_s23, 5  ;;  %s1614_s24 = sshll.u32 %s2138_s9, 9 }
 0x26e   : > { %s353_s18 = scalar_lea.vmem [#allocation10], %s1518_s25  ;;  %s2360_s20 = scalar_lea.hbm %s2410_s8, %s1614_s24 }
 0x26f   : > { %v1212_v51 = vsub.s32 0, %v1211_v50  ;;  %v1216_v53 = vsub.s32 1, %v1211_v50  ;;  %s1382_s22 = sshll.u32 %s353_s18, 4  ;;  %s1353_s21 = scalar_lea.sflag [#allocation11], %s2297_s23  ;;  %s2355_s22 = int_to_ptr.vmem [resolvable:$true] %s1382_s22 }
 0x270   : > { %s1982_s10 = scalar_lea.vmem %s2355_s22, 512  ;;  %s2069_s9 = smov [#allocation10]  }
 0x271   : > { %v1213_v54 = vrot.slane %v1208_v52, %v1212_v51  ;;  %v1217_v55 = vrot.slane %v1208_v52, %v1216_v53  ;;  %p1983_p2 = scmp.ne.s32.totalorder %s2355_s22, %s1982_s10  ;;  %s1986_s19 = sshll.u32 %s2069_s9, 4  ;;  %s1987_s19 = int_to_ptr.vmem [resolvable:$false] %s1986_s19 }
 0x272   : > { %s1988_s12 = scalar_lea.vmem %s1987_s19, 1024  ;;  %p1989_p8 = scmp.lt.s32.totalorder %s2355_s22, %s1987_s19 }
 0x273   : > { %p1984_p4 = pnand %p1983_p2, %p2421_p3  ;;  %p1990_p11 = scmp.lt.s32.totalorder %s1988_s12, %s1982_s10 }
 0x275   : > { %p1985_p7 = pneg %p1984_p4  ;;  %p1991_p0 = por %p1990_p11, %p1989_p8 }
 0x277   : > { %p1992_p6 = pnand %p1991_p0, %p1985_p7 }
 0x31f   : > { %v1334_v56 = vpop.f32.mrf.mxu1 }
 0x320   : > { %v1335_v57 = vadd.f32 %v1334_v56, %v1213_v54 }
 0x321   : > { %v1336_v58 = vpop.f32.mrf.mxu1 }
 0x322   : > { %1343 = vst [vmem:[%s353_s18] sm:$0xff] %v1335_v57  ;;  %v1337_v60 = vadd.f32 %v1336_v58, %v1217_v55 }
 0x323   : > { %v1338_v61 = vpop.f32.mrf.mxu1 }
 0x324   : > { %1344 = vst [vmem:[%s353_s18 + $0x8] sm:$0xff] %v1337_v60  ;;  %v1339_v62 = vadd.f32 %v1338_v61, %v1213_v54 }
 0x325   : > { %v1340_v63 = vpop.f32.mrf.mxu1 }
 0x326   : > { %1345 = vst [vmem:[%s353_s18 + $0x10] sm:$0xff] %v1339_v62  ;;  %v1341_v1 = vadd.f32 %v1340_v63, %v1217_v55 }
 0x328   : > { %1346 = vst [vmem:[%s353_s18 + $0x18] sm:$0xff] %v1341_v1 }
 0x329   : > { %1995 = shalt.err (!%p1992_p6)
}
 0x32a   : > { %s1996_s13 = scalar_lea.hbm %s2360_s20, 512  ;;  %s2000_s24 = scalar_lea.hbm %s2410_s8, 1024 }
 0x32b   : > { %p1997_p9 = scmp.ne.s32.totalorder %s2360_s20, %s1996_s13  ;;  %p2001_p1 = scmp.lt.s32.totalorder %s2360_s20, %s2410_s8 }
 0x32c   : > { %p2002_p10 = scmp.lt.s32.totalorder %s2000_s24, %s1996_s13 }
 0x32d   : > { %p1998_p13 = pnand %p1997_p9, %p2421_p3 }
 0x32e   : > { %p2003_p12 = por %p2002_p10, %p2001_p1 }
 0x32f   : > { %p1999_p5 = pneg %p1998_p13 }
 0x331   : > { %p2004_p2 = pnand %p2003_p12, %p1999_p5 }
 0x333   : > { %2007 = shalt.err (!%p2004_p2)
}
 0x334   : > { %s2070_s10 = smov 256   ;;  %s2071_s9 = smov 16  }
 0x335   : > { %1721 = dma.vmem_to_hbm [thread:$0]  (%p2421_p3), %s2355_s22, 512, %s2360_s20, %s1353_s21, %s2070_s10, %s2070_s10, %s2071_s9  }
 0x336 PF: > { %p1747_p4 = scmp.ge.s32.totalorder %s2054_s30, 2  ;;  %s1397_s19 = sand.u32 1, %s2042_s27  }
 0x337   : > { %p2422_p7 = scmp.ne.s32.totalorder %s2414_s16, 0  ;;  %s1398_s12 = scalar_lea.sflag [#allocation5], %s1397_s19 }
 0x339   : > { %p1735_p8 = pnand %p1747_p4, %p2422_p7 }
 0x33b   : > { %p1736_p11 = pneg %p1735_p8 }
 0x33d   : > { %2033 = dma.done.wait (%p1736_p11), %s1398_s12, 128  }
 0x33e   : > { %2035 = vsyncadd (%p1736_p11), %s1398_s12, 4294967168  ;;  %s1407_s13 = scalar_lea.sflag [#allocation11], %s1397_s19 }
 0x33f   : > { %2037 = dma.done.wait (%p1736_p11), %s1407_s13, 512  }
 0x340   : > { %2039 = vsyncadd (%p1736_p11), %s1407_s13, 4294966784  ;;  %p24_p3 = scmp.ge.s32.totalorder %s2142_s11, 4   ;;  %s2423_s27 = smov %s2046_s28 }
 0x341   : > { %s2424_s28 = smov %s2050_s29  ;;  %s2425_s29 = smov %s2153_s14 }
 0x342   : > { %s2426_s30 = smov %s2142_s11  ;;  %26 = sbr.rel (!%p24_p3) target bundleno = 7 (0x7), region = 117 }
 0x347   :  { %1412 = vsyncpa [#allocation4], 1 }
 0x348   :  { %1414 = vsyncpa [#allocation4 + $0x1], 1 }
 0x349   :  { %1415 = vsyncpa [#allocation7], 1 }
 0x34a   :  { %1416 = vsyncpa [#allocation5], 1 }
 0x34b   :  { %1418 = vsyncpa [#allocation5 + $0x1], 1 }
 0x34c   :  { %1419 = vsyncpa [#allocation11], 1 }
 0x34d   :  { %1421 = vsyncpa [#allocation11 + $0x1], 1 }

</bundles_post_ra>
